<compile_context>
chip_gen: v7x
topology: tpu7x:2x2x1
jax: 0.10.0
libtpu: 0.0.40
codegen_flags: <defaults>
</compile_context>

<pallas_src>
import functools

import jax
import jax.numpy as jnp
from jax.experimental import pallas as pl
from jax.experimental.pallas import tpu as pltpu


# ---------------------------------------------------------------------------
# Pallas kernel
# ---------------------------------------------------------------------------
def _gat_kernel(x_ref, w_ref, b_ref, s_ref, d_ref, out_ref,
                eln_ref, dcat_ref, *, negative_slope, num_heads):
    H = num_heads
    t = pl.program_id(0)

    # --- node-side projections: once, at the first edge tile -----------------
    @pl.when(t == 0)
    def _init():
        # [el_n | er_n | h] = x @ W_fused + b_fused    -> (N, 2H + Fout)
        proj = jnp.dot(x_ref[...], w_ref[...],
                       preferred_element_type=jnp.float32) + b_ref[...]
        eln_ref[...] = proj[:, :H].astype(jnp.bfloat16)        # (N, H)
        dcat_ref[...] = proj[:, H:].astype(jnp.bfloat16)       # (N, H+Fout) = [er_n | h]
        out_ref[...] = proj[:, 2 * H:]                         # out = h.clone()  (f32)

    S = s_ref[...]                                             # (TE, N) bf16 one-hot
    D = d_ref[...]                                             # (TE, N) bf16 one-hot

    # --- per-edge gathers (one pass over S, one fused pass over D) -----------
    el_e = jnp.dot(S, eln_ref[...], preferred_element_type=jnp.float32)   # (TE, H)
    de = jnp.dot(D, dcat_ref[...], preferred_element_type=jnp.float32)    # (TE, H+Fout)
    er_e = de[:, :H]                                                       # (TE, H)
    h_dst = de[:, H:]                                                      # (TE, Fout)

    # --- LeakyReLU + softmax over heads, mean over heads (module semantics) --
    e = el_e + er_e
    e = jnp.where(e > 0, e, negative_slope * e)
    m = jnp.max(e, axis=-1, keepdims=True)
    p = jnp.exp(e - m)
    inv = pl.reciprocal(jnp.sum(p, axis=-1, keepdims=True), approx=True)
    a = jnp.sum(p * inv, axis=-1, keepdims=True) * (1.0 / H)   # (TE, 1)
    # (padded edge rows have all-zero S/D rows -> contribute nothing below)

    # --- scatter-add into the resident output: S^T @ (a * h_dst) -------------
    # dot_general contracts the edge axis of S directly (no materialized S^T).
    msg = (a * h_dst).astype(jnp.bfloat16)                     # (TE, Fout)
    out_ref[...] += jax.lax.dot_general(
        S, msg,
        dimension_numbers=(((0,), (0,)), ((), ())),
        preferred_element_type=jnp.float32)                    # (N, Fout)


# ---------------------------------------------------------------------------
# Wrapper
# ---------------------------------------------------------------------------
def _head_block_matrix(attn):
    """attn: (1, H, F) -> (H*F, H), block h filled with attn[0, h, :]."""
    _, H, F = attn.shape
    eye = jnp.eye(H, dtype=attn.dtype)
    return (attn[0][:, :, None] * eye[:, None, :]).reshape(H * F, H)


def gat_conv_layer(features, edge_index, params, *, num_heads=3,
                   negative_slope=0.2, edge_tile=128):
    x = features.astype(jnp.float32)
    N, Fin = x.shape
    H = num_heads
    Fout = params["wlinT"].shape[1]
    E = edge_index.shape[1]

    # ---- algebraic folding of the attention-logit projections ----
    almat = _head_block_matrix(params["attnl"])         # (H*Fin, H)
    armat = _head_block_matrix(params["attnr"])         # (H*Fin, H)
    w_el = params["welT"] @ almat                       # (Fin, H)
    w_er = params["werT"] @ armat                       # (Fin, H)
    b_el = params["bel"] @ almat                        # (1, H)
    b_er = params["ber"] @ armat                        # (1, H)

    # fused projection weight/bias: columns [el_n | er_n | h]
    w_fused = jnp.concatenate([w_el, w_er, params["wlinT"]], axis=1)  # (Fin, 2H+Fout)
    b_fused = jnp.concatenate([b_el, b_er, params["blin"]], axis=1)   # (1, 2H+Fout)
    P = 2 * H + Fout

    # ---- pad edges to a multiple of the edge tile (pad index N -> zero row) ----
    TE = edge_tile
    n_tiles = max(1, -(-E // TE))
    E_pad = n_tiles * TE
    pad = E_pad - E
    src = jnp.concatenate([edge_index[0],
                           jnp.full((pad,), N, edge_index.dtype)])
    dst = jnp.concatenate([edge_index[1],
                           jnp.full((pad,), N, edge_index.dtype)])
    # one-hot gather/scatter matrices in bf16 (0/1 exact, halves HBM/VMEM bytes)
    S = jax.nn.one_hot(src, N, dtype=jnp.bfloat16)      # (E_pad, N)
    D = jax.nn.one_hot(dst, N, dtype=jnp.bfloat16)      # (E_pad, N)

    kernel = functools.partial(_gat_kernel,
                               negative_slope=negative_slope,
                               num_heads=H)

    out = pl.pallas_call(
        kernel,
        out_shape=jax.ShapeDtypeStruct((N, Fout), jnp.float32),
        grid=(n_tiles,),
        in_specs=[
            pl.BlockSpec((N, Fin), lambda t: (0, 0)),     # x (whole, reused)
            pl.BlockSpec((Fin, P), lambda t: (0, 0)),     # fused weight
            pl.BlockSpec((1, P), lambda t: (0, 0)),       # fused bias
            pl.BlockSpec((TE, N), lambda t: (t, 0)),      # S edge tile (streamed)
            pl.BlockSpec((TE, N), lambda t: (t, 0)),      # D edge tile (streamed)
        ],
        out_specs=pl.BlockSpec((N, Fout), lambda t: (0, 0)),  # resident accumulator
        scratch_shapes=[
            pltpu.VMEM((N, H), jnp.bfloat16),             # el_n
            pltpu.VMEM((N, H + Fout), jnp.bfloat16),      # [er_n | h]
        ],
        compiler_params=pltpu.CompilerParams(
            dimension_semantics=("arbitrary",),           # reduction over edge tiles
            vmem_limit_bytes=48 * 1024 * 1024,            # headroom below v7x 64 MiB
        ),
    )(x, w_fused, b_fused, S, D)
    return out


# ---------------------------------------------------------------------------
# Deterministic parameter init (xavier_normal with gain=sqrt(2), zero biases)
# ---------------------------------------------------------------------------
def init_params(key, in_features, out_features, num_heads):
    gain = jnp.sqrt(2.0)
    ks = jax.random.split(key, 5)

    def xavier(k, fan_in, fan_out, shape):
        std = gain * jnp.sqrt(2.0 / (fan_in + fan_out))
        return std * jax.random.normal(k, shape, dtype=jnp.float32)

    Fin, Fout, H = in_features, out_features, num_heads
    # torch Linear weight is (out, in); we store transposed (in, out)
    wlin = xavier(ks[0], Fin, Fout, (Fout, Fin))
    wel = xavier(ks[1], Fin, H * Fin, (H * Fin, Fin))
    wer = xavier(ks[2], Fin, H * Fin, (H * Fin, Fin))
    attnl = xavier(ks[3], H * Fin, Fin, (1, H, Fin))
    attnr = xavier(ks[4], H * Fin, Fin, (1, H, Fin))
    return {
        "wlinT": wlin.T, "blin": jnp.zeros((1, Fout), jnp.float32),
        "welT": wel.T,   "bel": jnp.zeros((1, H * Fin), jnp.float32),
        "werT": wer.T,   "ber": jnp.zeros((1, H * Fin), jnp.float32),
        "attnl": attnl, "attnr": attnr,
    }


# ---------------------------------------------------------------------------
# Pure-JAX f32 reference of the torch forward (eval mode, dropout = identity)
# ---------------------------------------------------------------------------
def gat_reference(features, edge_index, params, num_heads, negative_slope):
    x = features.astype(jnp.float32)
    N, Fin = x.shape
    src, dst = edge_index[0], edge_index[1]
    fc_src = (x @ params["welT"] + params["bel"]).reshape(N, num_heads, Fin)
    fc_dst = (x @ params["werT"] + params["ber"]).reshape(N, num_heads, Fin)
    el = (fc_src[src] * params["attnl"]).sum(-1)[..., None]   # (E, H, 1)
    er = (fc_dst[dst] * params["attnr"]).sum(-1)[..., None]
    e = jax.nn.leaky_relu(el + er, negative_slope)
    a = jax.nn.softmax(e, axis=1).mean(axis=1)                # (E, 1)
    h = x @ params["wlinT"] + params["blin"]
    out = h + jax.ops.segment_sum(a * h[dst], src, num_segments=N)
    return out


if __name__ == "__main__":
    N, Fin, Fout, H, E = 64, 16, 32, 3, 200
    key = jax.random.PRNGKey(0)
    k_x, k_src, k_dst, k_p = jax.random.split(key, 4)

    features = jax.random.normal(k_x, (N, Fin), dtype=jnp.float32)
    edge_index = jnp.stack([
        jax.random.randint(k_src, (E,), 0, N),
        jax.random.randint(k_dst, (E,), 0, N),
    ])                                                        # (2, E)
    params = init_params(k_p, Fin, Fout, H)

    out = gat_conv_layer(features, edge_index, params,
                         num_heads=H, negative_slope=0.2, edge_tile=128)
    out = jax.block_until_ready(out)

    ref = gat_reference(features, edge_index, params, H, 0.2)
    assert out.shape == (N, Fout)
    # bf16 MXU operands with f32 accumulation -> compare at bf16-level tolerance
    assert jnp.allclose(out, ref, rtol=2e-2, atol=2e-2), "mismatch vs reference"

    print("KERNEL_OK")
</pallas_src>

<mosaic_0001>
module attributes {stable_mosaic.version = 11 : i64} {
  func.func @_gat_kernel(%arg0: i32, %arg1: memref<64x16xf32, #tpu.memory_space<vmem>>, %arg2: memref<16x38xf32, #tpu.memory_space<vmem>>, %arg3: memref<1x38xf32, #tpu.memory_space<vmem>>, %arg4: memref<128x64xbf16, #tpu.memory_space<vmem>>, %arg5: memref<128x64xbf16, #tpu.memory_space<vmem>>, %arg6: memref<64x32xf32, #tpu.memory_space<vmem>>, %arg7: memref<64x3xbf16, #tpu.memory_space<vmem>>, %arg8: memref<64x35xbf16, #tpu.memory_space<vmem>>) attributes {dimension_semantics = [#tpu.dimension_semantics<arbitrary>], iteration_bounds = array<i64: 2>, scalar_prefetch = 0 : i64, scratch_operands = 2 : i64, tpu.core_type = #tpu.core_type<tc>, window_params = [{pipeline_mode = #tpu.pipeline_mode<synchronous>, transform_indices = @transform_0, window_bounds = array<i64: 64, 16>}, {pipeline_mode = #tpu.pipeline_mode<synchronous>, transform_indices = @transform_1, window_bounds = array<i64: 16, 38>}, {pipeline_mode = #tpu.pipeline_mode<synchronous>, transform_indices = @transform_2, window_bounds = array<i64: 1, 38>}, {transform_indices = @transform_3, window_bounds = array<i64: 128, 64>}, {transform_indices = @transform_4, window_bounds = array<i64: 128, 64>}, {pipeline_mode = #tpu.pipeline_mode<synchronous>, transform_indices = @transform_5, window_bounds = array<i64: 64, 32>}]} {
    %c0_i32 = arith.constant 0 : i32
    %0 = arith.cmpi eq, %arg0, %c0_i32 : i32
    %1 = arith.extui %0 : i1 to i32
    %c0_i32_0 = arith.constant 0 : i32
    %2 = arith.cmpi ne, %1, %c0_i32_0 : i32
    scf.if %2 {
      %c0_20 = arith.constant 0 : index
      %c0_21 = arith.constant 0 : index
      %38 = vector.load %arg1[%c0_20, %c0_21] : memref<64x16xf32, #tpu.memory_space<vmem>>, vector<64x16xf32>
      %c0_22 = arith.constant 0 : index
      %c0_23 = arith.constant 0 : index
      %39 = vector.load %arg2[%c0_22, %c0_23] : memref<16x38xf32, #tpu.memory_space<vmem>>, vector<16x38xf32>
      %cst_24 = arith.constant dense<0.000000e+00> : vector<64x38xf32>
      %40 = tpu.matmul %38, %39, %cst_24 {dimension_numbers = #tpu.dot_dimension_numbers<[1], [0], [0], [1], [0, 0, 1, 1], [], []>} : vector<64x16xf32>, vector<16x38xf32>, vector<64x38xf32> -> vector<64x38xf32>
      %c0_25 = arith.constant 0 : index
      %c0_26 = arith.constant 0 : index
      %41 = vector.load %arg3[%c0_25, %c0_26] : memref<1x38xf32, #tpu.memory_space<vmem>>, vector<1x38xf32>
      %42 = vector.broadcast %41 : vector<1x38xf32> to vector<64x38xf32>
      %43 = arith.addf %40, %42 : vector<64x38xf32>
      %44 = vector.extract_strided_slice %43 {offsets = [0, 0], sizes = [64, 3], strides = [1, 1]} : vector<64x38xf32> to vector<64x3xf32>
      %45 = arith.truncf %44 : vector<64x3xf32> to vector<64x3xbf16>
      %c0_27 = arith.constant 0 : index
      %c0_28 = arith.constant 0 : index
      %46 = vector.load %arg7[%c0_27, %c0_28] : memref<64x3xbf16, #tpu.memory_space<vmem>>, vector<64x3xbf16>
      tpu.vector_store %arg7[%c0_27, %c0_28], %45 {strides = array<i32>} : memref<64x3xbf16, #tpu.memory_space<vmem>>, vector<64x3xbf16>,
      %47 = vector.extract_strided_slice %43 {offsets = [0, 3], sizes = [64, 35], strides = [1, 1]} : vector<64x38xf32> to vector<64x35xf32>
      %48 = arith.truncf %47 : vector<64x35xf32> to vector<64x35xbf16>
      %c0_29 = arith.constant 0 : index
      %c0_30 = arith.constant 0 : index
      %49 = vector.load %arg8[%c0_29, %c0_30] : memref<64x35xbf16, #tpu.memory_space<vmem>>, vector<64x35xbf16>
      tpu.vector_store %arg8[%c0_29, %c0_30], %48 {strides = array<i32>} : memref<64x35xbf16, #tpu.memory_space<vmem>>, vector<64x35xbf16>,
      %50 = vector.extract_strided_slice %43 {offsets = [0, 6], sizes = [64, 32], strides = [1, 1]} : vector<64x38xf32> to vector<64x32xf32>
      %c0_31 = arith.constant 0 : index
      %c0_32 = arith.constant 0 : index
      %51 = vector.load %arg6[%c0_31, %c0_32] : memref<64x32xf32, #tpu.memory_space<vmem>>, vector<64x32xf32>
      tpu.vector_store %arg6[%c0_31, %c0_32], %50 {strides = array<i32>} : memref<64x32xf32, #tpu.memory_space<vmem>>, vector<64x32xf32>,
    } else {
    }
    %c0 = arith.constant 0 : index
    %c0_1 = arith.constant 0 : index
    %3 = vector.load %arg4[%c0, %c0_1] : memref<128x64xbf16, #tpu.memory_space<vmem>>, vector<128x64xbf16>
    %c0_2 = arith.constant 0 : index
    %c0_3 = arith.constant 0 : index
    %4 = vector.load %arg5[%c0_2, %c0_3] : memref<128x64xbf16, #tpu.memory_space<vmem>>, vector<128x64xbf16>
    %c0_4 = arith.constant 0 : index
    %c0_5 = arith.constant 0 : index
    %5 = vector.load %arg7[%c0_4, %c0_5] : memref<64x3xbf16, #tpu.memory_space<vmem>>, vector<64x3xbf16>
    %cst = arith.constant dense<0.000000e+00> : vector<128x3xf32>
    %6 = tpu.matmul %3, %5, %cst {dimension_numbers = #tpu.dot_dimension_numbers<[1], [0], [0], [1], [0, 0, 1, 1], [], []>} : vector<128x64xbf16>, vector<64x3xbf16>, vector<128x3xf32> -> vector<128x3xf32>
    %c0_6 = arith.constant 0 : index
    %c0_7 = arith.constant 0 : index
    %7 = vector.load %arg8[%c0_6, %c0_7] : memref<64x35xbf16, #tpu.memory_space<vmem>>, vector<64x35xbf16>
    %cst_8 = arith.constant dense<0.000000e+00> : vector<128x35xf32>
    %8 = tpu.matmul %4, %7, %cst_8 {dimension_numbers = #tpu.dot_dimension_numbers<[1], [0], [0], [1], [0, 0, 1, 1], [], []>} : vector<128x64xbf16>, vector<64x35xbf16>, vector<128x35xf32> -> vector<128x35xf32>
    %9 = vector.extract_strided_slice %8 {offsets = [0, 0], sizes = [128, 3], strides = [1, 1]} : vector<128x35xf32> to vector<128x3xf32>
    %10 = vector.extract_strided_slice %8 {offsets = [0, 3], sizes = [128, 32], strides = [1, 1]} : vector<128x35xf32> to vector<128x32xf32>
    %11 = arith.addf %6, %9 : vector<128x3xf32>
    %cst_9 = arith.constant 0.000000e+00 : f32
    %12 = vector.broadcast %cst_9 : f32 to vector<128x3xf32>
    %13 = arith.cmpf ogt, %11, %12 : vector<128x3xf32>
    %cst_10 = arith.constant 2.000000e-01 : f32
    %14 = vector.broadcast %cst_10 : f32 to vector<128x3xf32>
    %15 = arith.mulf %14, %11 : vector<128x3xf32>
    %16 = arith.select %13, %11, %15 : vector<128x3xi1>, vector<128x3xf32>
    %cst_11 = arith.constant dense<0xFF800000> : vector<128xf32>
    %17 = vector.multi_reduction <maximumf>, %16, %cst_11 [1] : vector<128x3xf32> to vector<128xf32>
    %18 = vector.shape_cast %17 : vector<128xf32> to vector<128x1xf32>
    %19 = vector.broadcast %18 : vector<128x1xf32> to vector<128x3xf32>
    %20 = arith.subf %16, %19 : vector<128x3xf32>
    %21 = math.exp %20 : vector<128x3xf32>
    %cst_12 = arith.constant dense<0.000000e+00> : vector<128xf32>
    %22 = vector.multi_reduction <add>, %21, %cst_12 [1] : vector<128x3xf32> to vector<128xf32>
    %23 = vector.shape_cast %22 : vector<128xf32> to vector<128x1xf32>
    %24 = tpu.reciprocal %23 {approx = true} : vector<128x1xf32> -> vector<128x1xf32>
    %25 = vector.broadcast %24 : vector<128x1xf32> to vector<128x3xf32>
    %26 = arith.mulf %21, %25 : vector<128x3xf32>
    %cst_13 = arith.constant dense<0.000000e+00> : vector<128xf32>
    %27 = vector.multi_reduction <add>, %26, %cst_13 [1] : vector<128x3xf32> to vector<128xf32>
    %28 = vector.shape_cast %27 : vector<128xf32> to vector<128x1xf32>
    %cst_14 = arith.constant 0.333333343 : f32
    %29 = vector.broadcast %cst_14 : f32 to vector<128x1xf32>
    %30 = arith.mulf %28, %29 : vector<128x1xf32>
    %31 = vector.broadcast %30 : vector<128x1xf32> to vector<128x32xf32>
    %32 = arith.mulf %31, %10 : vector<128x32xf32>
    %33 = arith.truncf %32 : vector<128x32xf32> to vector<128x32xbf16>
    %c0_15 = arith.constant 0 : index
    %c0_16 = arith.constant 0 : index
    %34 = vector.load %arg6[%c0_15, %c0_16] : memref<64x32xf32, #tpu.memory_space<vmem>>, vector<64x32xf32>
    %cst_17 = arith.constant dense<0.000000e+00> : vector<64x32xf32>
    %35 = tpu.matmul %3, %33, %cst_17 {dimension_numbers = #tpu.dot_dimension_numbers<[0], [0], [1], [1], [0, 1, 1, 1], [], []>} : vector<128x64xbf16>, vector<128x32xbf16>, vector<64x32xf32> -> vector<64x32xf32>
    %36 = arith.addf %34, %35 : vector<64x32xf32>
    %c0_18 = arith.constant 0 : index
    %c0_19 = arith.constant 0 : index
    %37 = vector.load %arg6[%c0_18, %c0_19] : memref<64x32xf32, #tpu.memory_space<vmem>>, vector<64x32xf32>
    tpu.vector_store %arg6[%c0_18, %c0_19], %36 {strides = array<i32>} : memref<64x32xf32, #tpu.memory_space<vmem>>, vector<64x32xf32>,
    return
  }
  func.func @transform_0(%arg0: i32) -> (i32, i32) {
    %c0_i32 = arith.constant 0 : i32
    %c0_i32_0 = arith.constant 0 : i32
    %c0_i32_1 = arith.constant 0 : i32
    return %c0_i32, %c0_i32_0 : i32, i32
  }
  func.func @transform_1(%arg0: i32) -> (i32, i32) {
    %c0_i32 = arith.constant 0 : i32
    %c0_i32_0 = arith.constant 0 : i32
    %c0_i32_1 = arith.constant 0 : i32
    return %c0_i32, %c0_i32_0 : i32, i32
  }
  func.func @transform_2(%arg0: i32) -> (i32, i32) {
    %c0_i32 = arith.constant 0 : i32
    %c0_i32_0 = arith.constant 0 : i32
    %c0_i32_1 = arith.constant 0 : i32
    return %c0_i32, %c0_i32_0 : i32, i32
  }
  func.func @transform_3(%arg0: i32) -> (i32, i32) {
    %c0_i32 = arith.constant 0 : i32
    %c0_i32_0 = arith.constant 0 : i32
    return %arg0, %c0_i32 : i32, i32
  }
  func.func @transform_4(%arg0: i32) -> (i32, i32) {
    %c0_i32 = arith.constant 0 : i32
    %c0_i32_0 = arith.constant 0 : i32
    return %arg0, %c0_i32 : i32, i32
  }
  func.func @transform_5(%arg0: i32) -> (i32, i32) {
    %c0_i32 = arith.constant 0 : i32
    %c0_i32_0 = arith.constant 0 : i32
    %c0_i32_1 = arith.constant 0 : i32
    return %c0_i32, %c0_i32_0 : i32, i32
  }
}

</mosaic_0001>

<bundles_post_ra>
// kernel: tpu_custom_call.1
= control target key start
LH: loop header
LB: loop body
LE: loop exit
PB: predicated region body
PF: predicated region fallthrough
CT: control target
= control target key end

     0   :  { %s1659_s18 = smov 0   ;;  %s2125_s0 = inlined_call_operand.vmem [shape: f32[64,16], index: 0, kind: input, shape index: {}]   ;;  %s2126_s1 = inlined_call_operand.vmem [shape: f32[16,38], index: 1, kind: input, shape index: {}]   ;;  %s2127_s2 = inlined_call_operand.vmem [shape: f32[1,38], index: 2, kind: input, shape index: {}]   ;;  %s2128_s3 = inlined_call_operand.vmem [shape: bf16[256,64], index: 3, kind: input, shape index: {}]   ;;  %s2129_s4 = inlined_call_operand.vmem [shape: bf16[256,64], index: 4, kind: input, shape index: {}]   ;;  %s2130_s5 = inlined_call_operand.vmem [shape: f32[64,32], index: 5, kind: output, shape index: {}]  }
   0x1 LB: > { %s1319_s19 = sadd.s32 4294967295, %s1624_s18   ;;  %p1322_p0 = scmp.ge.s32.totalorder %s1624_s18, 1  ;;  %s1624_s18 = sphi %s1659_s18, %s15_s18  }
   0x2   : > { %p194_p1 = scmp.lt.s32.totalorder %s1624_s18, 3 }
   0x4   : > { %p195_p2 = pnand %p1322_p0, %p194_p1 }
   0x5   : > { %s1323_s20 = sshll.u32 (!%p195_p2), %s1319_s19, 4  ;;  %p1327_p4 = scmp.ne.s32.totalorder (!%p195_p2), %s1319_s19, 0 }
   0x6   : > { %198 = sbr.rel (%p195_p2) target bundleno = 1462 (0x5b6), region = 40  ;;  %p223_p3 = scmp.lt.s32.totalorder (!%p195_p2), %s1323_s20, 31 }
   0xd   : > { %s2132_s20 = smov (!%p223_p3, %s1323_s20), 31  ;;  %238 = sbr.rel (%p1327_p4) target bundleno = 372 (0x174), region = 44 }
   0xe   : > { %s1324_s21 = sshll.u32 %s2132_s20, 2  ;;  %v247_v0 = vld [vmem:[%s2126_s1] sm:$0xff] (!%p1327_p4)  ;;  %v248_v1 = vld [vmem:[%s2126_s1 + $0x8] sm:$0xff] (!%p1327_p4)  ;;  %vm256_vm0 = vcmask (!%p1327_p4), 130048   ;;  %v241_v7 = vld [vmem:[%s2125_s0 + $0x10] sm:$0xff] (!%p1327_p4)  ;;  %vm390_vm1 = vcmask (!%p1327_p4), 23552  }
   0xf   : > { %s1670_s24 = scalar_lea.vmem %s2128_s3, %s1324_s21  ;;  %s1675_s27 = scalar_lea.vmem %s2129_s4, %s1324_s21  ;;  %v239_v2 = vld [vmem:[%s2125_s0] sm:$0xff] (!%p1327_p4)  ;;  %v1505_v3 = vpack.c.bf16 (!%p1327_p4), %v248_v1, %v247_v0  ;;  %v240_v5 = vld [vmem:[%s2125_s0 + $0x8] sm:$0xff] (!%p1327_p4)  ;;  %v245_v8 = vld [vmem:[%s2125_s0 + $0x30] sm:$0xff] (!%p1327_p4)  ;;  %vm448_vm2 = vcmask (!%p1327_p4), 261120   ;;  %vm411_vm3 = vcmask (!%p1327_p4), 285696  }
  0x10   : > { %1421 = vmatprep.mubr.msk.f32.mxu0 (!%p1327_p4), %vm256_vm0, %v239_v2  ;;  %v243_v4 = vld [vmem:[%s2125_s0 + $0x20] sm:$0xff] (!%p1327_p4)  ;;  %v244_v6 = vld [vmem:[%s2125_s0 + $0x28] sm:$0xff] (!%p1327_p4)  ;;  %v242_v9 = vld [vmem:[%s2125_s0 + $0x18] sm:$0xff] (!%p1327_p4)  ;;  %s1626_s28 = smov (!%p1327_p4), 122   ;;  %s1627_s29 = smov (!%p1327_p4), 125  }
  0x11   : > { %1427 = vmatprep.mubr.msk.f32.mxu1 (!%p1327_p4), %vm256_vm0, %v243_v4  ;;  %1506 = vmatprep.subr.bf16.mxu0 (!%p1327_p4), %v1505_v3  ;;  %v246_v10 = vld [vmem:[%s2125_s0 + $0x38] sm:$0xff] (!%p1327_p4)  ;;  %v1328_v11 = vld [vmem:[%s2127_s2] ss:$0 sm:$0xff] (!%p1327_p4) }
  0x12   : > { %1509 = vmatprep.subr.bf16.mxu1 (!%p1327_p4), %v1505_v3  ;;  %1508 = vmatpush3.bf16.msra.mxu0 (!%p1327_p4), %v1505_v3 }
  0x13   : > { %1510 = vmatpush3.bf16.msra.mxu1 (!%p1327_p4), %v1505_v3 }
  0x15   : > { %1422 = vmatmul.mubr.msk.f32.vlgmr.msra.gmra.mrb[0].mxu0 %vm256_vm0, %v240_v5 }
  0x16   : > { %1428 = vmatmul.mubr.msk.f32.vlgmr.msra.gmra.mrb[0].mxu1 %vm256_vm0, %v244_v6  ;;  %1424 = vmatprep.mubr.msk.f32.mxu0 %vm256_vm0, %v241_v7 }
  0x17   : > { %1430 = vmatprep.mubr.msk.f32.mxu1 %vm256_vm0, %v245_v8 }
  0x19   : > { %1425 = vmatmul.mubr.msk.f32.gmra.mrb[2].mxu0 %vm256_vm0, %v242_v9 }
  0x1a   : > { %1431 = vmatmul.mubr.msk.f32.gmra.mrb[2].mxu1 %vm256_vm0, %v246_v10 }
  0xe8   : > { %v1423_v12 = vpop.f32.mrb[0].mxu0 }
  0xe9   : > { %v1429_v13 = vpop.f32.mrb[0].mxu1  ;;  %v353_v14 = vadd.f32 %v1423_v12, %v1328_v11  ;;  %v347_v15 = vpop.f32.mrb[1].mxu0 }
  0xea   : > { %v373_v16 = vadd.f32 %v1429_v13, %v1328_v11  ;;  %v367_v17 = vpop.f32.mrb[1].mxu1  ;;  %v348_v18 = vadd.f32 %v1328_v11, %v347_v15 }
  0xeb   : > { %v368_v19 = vadd.f32 %v1328_v11, %v367_v17  ;;  %426 = vrot.lane.b32.xlu1 %v353_v14, %s1626_s28 }
  0xec   : > { %v386_v20 = vpack.c.bf16 %v353_v14, %v348_v18  ;;  %424 = vrot.lane.b32.xlu0 %v348_v18, %s1626_s28  ;;  %v1426_v22 = vpop.f32.mrb[2].mxu0 }
  0xed   : > { %v388_v21 = vpack.c.bf16 %v373_v16, %v368_v19  ;;  %v1432_v23 = vpop.f32.mrb[2].mxu1  ;;  %v363_v24 = vadd.f32 %v1426_v22, %v1328_v11  ;;  %v357_v25 = vpop.f32.mrb[3].mxu0 }
  0xee   : > { %v383_v26 = vadd.f32 %v1432_v23, %v1328_v11  ;;  %v377_v27 = vpop.f32.mrb[3].mxu1  ;;  %391 = vst.msk [vmem:[#allocation2] sm:$0xff] %vm390_vm1, %v386_v20  ;;  %v358_v28 = vadd.f32 %v1328_v11, %v357_v25 }
  0xef   : > { %393 = vst.msk [vmem:[#allocation2 + $0x10] sm:$0xff] %vm390_vm1, %v388_v21  ;;  %v378_v29 = vadd.f32 %v1328_v11, %v377_v27  ;;  %434 = vrot.lane.b32.xlu1 %v373_v16, %s1626_s28 }
  0xf0   : > { %432 = vrot.lane.b32.xlu0 %v368_v19, %s1626_s28  ;;  %v387_v30 = vpack.c.bf16 %v363_v24, %v358_v28 }
  0xf1   : > { %v389_v31 = vpack.c.bf16 %v383_v26, %v378_v29 }
  0xf2   : > { %392 = vst.msk [vmem:[#allocation2 + $0x8] sm:$0xff] %vm390_vm1, %v387_v30 }
  0xf3   : > { %394 = vst.msk [vmem:[#allocation2 + $0x18] sm:$0xff] %vm390_vm1, %v389_v31  ;;  %403 = vrot.lane.b32.xlu1 %v388_v21, %s1627_s29 }
  0xf4   : > { %399 = vrot.lane.b32.xlu0 %v386_v20, %s1627_s29 }
  0xf7   : > { %430 = vrot.lane.b32.xlu1 %v363_v24, %s1626_s28 }
  0xf8   : > { %428 = vrot.lane.b32.xlu0 %v358_v28, %s1626_s28 }
  0xfb   : > { %405 = vrot.lane.b32.xlu1 %v389_v31, %s1627_s29 }
  0xfc   : > { %401 = vrot.lane.b32.xlu0 %v387_v30, %s1627_s29 }
  0xff   : > { %438 = vrot.lane.b32.xlu1 %v383_v26, %s1626_s28 }
 0x100   : > { %436 = vrot.lane.b32.xlu0 %v378_v29, %s1626_s28 }
 0x15d   : > { %v427_v32 = vpop.permute.xlu1 %426 }
 0x15e   : > { %450 = vst.msk [vmem:[%s2130_s5 + $0x8] sm:$0xff] %vm448_vm2, %v427_v32  ;;  %v425_v33 = vpop.permute.xlu0 %424 }
 0x15f   : > { %449 = vst.msk [vmem:[%s2130_s5] sm:$0xff] %vm448_vm2, %v425_v33 }
 0x161   : > { %v435_v34 = vpop.permute.xlu1 %434 }
 0x162   : > { %454 = vst.msk [vmem:[%s2130_s5 + $0x28] sm:$0xff] %vm448_vm2, %v435_v34  ;;  %v433_v35 = vpop.permute.xlu0 %432 }
 0x163   : > { %453 = vst.msk [vmem:[%s2130_s5 + $0x20] sm:$0xff] %vm448_vm2, %v433_v35 }
 0x165   : > { %v404_v36 = vpop.permute.xlu1 %403 }
 0x166   : > { %414 = vst.msk [vmem:[#allocation3 + $0x10] sm:$0xff] %vm411_vm3, %v404_v36  ;;  %v400_v37 = vpop.permute.xlu0 %399 }
 0x167   : > { %412 = vst.msk [vmem:[#allocation3] sm:$0xff] %vm411_vm3, %v400_v37 }
 0x169   : > { %v431_v38 = vpop.permute.xlu1 %430 }
 0x16a   : > { %452 = vst.msk [vmem:[%s2130_s5 + $0x18] sm:$0xff] %vm448_vm2, %v431_v38  ;;  %v429_v39 = vpop.permute.xlu0 %428 }
 0x16b   : > { %451 = vst.msk [vmem:[%s2130_s5 + $0x10] sm:$0xff] %vm448_vm2, %v429_v39 }
 0x16d   : > { %v406_v40 = vpop.permute.xlu1 %405 }
 0x16e   : > { %415 = vst.msk [vmem:[#allocation3 + $0x18] sm:$0xff] %vm411_vm3, %v406_v40  ;;  %v402_v41 = vpop.permute.xlu0 %401 }
 0x16f   : > { %413 = vst.msk [vmem:[#allocation3 + $0x8] sm:$0xff] %vm411_vm3, %v402_v41 }
 0x171   : > { %v439_v42 = vpop.permute.xlu1 %438 }
 0x172   : > { %456 = vst.msk [vmem:[%s2130_s5 + $0x38] sm:$0xff] %vm448_vm2, %v439_v42  ;;  %v437_v43 = vpop.permute.xlu0 %436 }
 0x173   : > { %455 = vst.msk [vmem:[%s2130_s5 + $0x30] sm:$0xff] %vm448_vm2, %v437_v43 }
 0x174 PF: > { %v493_v44 = vld [vmem:[#allocation3] sm:$0xff]  ;;  %v490_v47 = vld [vmem:[#allocation2 + $0x8] sm:$0xff]  ;;  %v495_v48 = vld [vmem:[#allocation3 + $0x10] sm:$0xff]  ;;  %vm537_vm4 = vcmask 523264   ;;  %vm868_vm6 = vcmask 23552  }
 0x175   : > { %v489_v45 = vld [vmem:[#allocation2] sm:$0xff]  ;;  %1433 = vmatprep.subr.bf16.mxu0 %v493_v44  ;;  %v491_v49 = vld [vmem:[#allocation2 + $0x10] sm:$0xff]  ;;  %v496_v52 = vld [vmem:[#allocation3 + $0x18] sm:$0xff] }
 0x176   : > { %v494_v46 = vld [vmem:[#allocation3 + $0x8] sm:$0xff]  ;;  %1457 = vmatprep.subr.bf16.mxu1 %v489_v45  ;;  %1434 = vmatpush3.bf16.msra.mxu0 %v493_v44  ;;  %v1538_v50 = vld [vmem:[%s1675_s27] sm:$0xff]   ;;  %v492_v53 = vld [vmem:[#allocation2 + $0x18] sm:$0xff] }
 0x177   : > { %1458 = vmatpush3.bf16.msra.mxu1 %v489_v45  ;;  %1435 = vmatprep.subr.bf16.mxu0 %v494_v46  ;;  %v1756_v51 = vld [vmem:[%s1670_s24] sm:$0xff]   ;;  %v1540_v54 = vld [vmem:[%s1675_s27 + $0x8] sm:$0xff]   ;;  %v1542_v56 = vld [vmem:[%s1675_s27 + $0x10] sm:$0xff]  }
 0x178   : > { %1459 = vmatprep.subr.bf16.mxu1 %v490_v47  ;;  %1441 = vmatprep.mubr.msk.bf16.mxu0 %vm537_vm4, %v1538_v50  ;;  %v1763_v55 = vld [vmem:[%s1670_s24 + $0x8] sm:$0xff]   ;;  %v1767_v57 = vld [vmem:[%s1670_s24 + $0x10] sm:$0xff]   ;;  %v1544_v58 = vld [vmem:[%s1675_s27 + $0x18] sm:$0xff]  }
 0x179   : > { %1465 = vmatprep.mubr.msk.bf16.mxu1 %vm537_vm4, %v1756_v51  ;;  %v1777_v59 = vld [vmem:[%s1670_s24 + $0x18] sm:$0xff]   ;;  %v1546_v60 = vld [vmem:[%s1675_s27 + $0x20] sm:$0xff]   ;;  %v1548_v62 = vld [vmem:[%s1675_s27 + $0x28] sm:$0xff]  }
 0x17a   : > { %1436 = vmatpush3.bf16.msra.mxu0 %v494_v46  ;;  %v1781_v61 = vld [vmem:[%s1670_s24 + $0x20] sm:$0xff]   ;;  %v1791_v63 = vld [vmem:[%s1670_s24 + $0x28] sm:$0xff]   ;;  %v1550_v0 = vld [vmem:[%s1675_s27 + $0x30] sm:$0xff]  }
 0x17b   : > { %1460 = vmatpush3.bf16.msra.mxu1 %v490_v47  ;;  %1437 = vmatprep.subr.bf16.mxu0 %v495_v48  ;;  %v1795_v1 = vld [vmem:[%s1670_s24 + $0x30] sm:$0xff]   ;;  %v1552_v2 = vld [vmem:[%s1675_s27 + $0x38] sm:$0xff]  }
 0x17c   : > { %1461 = vmatprep.subr.bf16.mxu1 %v491_v49  ;;  %v1805_v3 = vld [vmem:[%s1670_s24 + $0x38] sm:$0xff]   ;;  %s1628_s24 = smov 125  }
 0x17e   : > { %1438 = vmatpush3.bf16.msra.mxu0 %v495_v48 }
 0x17f   : > { %1462 = vmatpush3.bf16.msra.mxu1 %v491_v49  ;;  %1439 = vmatprep.subr.bf16.mxu0 %v496_v52 }
 0x180   : > { %1463 = vmatprep.subr.bf16.mxu1 %v492_v53 }
 0x182   : > { %1440 = vmatpush3.bf16.msra.mxu0 %v496_v52 }
 0x183   : > { %1464 = vmatpush3.bf16.msra.mxu1 %v492_v53 }
 0x185   : > { %1442 = vmatmul.mubr.msk.bf16.vlgmr.msra.gmra.mrb[0].mxu0 %vm537_vm4, %v1540_v54 }
 0x186   : > { %1466 = vmatmul.mubr.msk.bf16.vlgmr.msra.gmra.mrb[0].mxu1 %vm537_vm4, %v1763_v55  ;;  %1445 = vmatprep.mubr.msk.bf16.mxu0 %vm537_vm4, %v1542_v56 }
 0x187   : > { %1469 = vmatprep.mubr.msk.bf16.mxu1 %vm537_vm4, %v1767_v57 }
 0x18d   : > { %1446 = vmatmul.mubr.msk.bf16.gmra.mrb[4].mxu0 %vm537_vm4, %v1544_v58 }
 0x18e   : > { %1470 = vmatmul.mubr.msk.bf16.gmra.mrb[4].mxu1 %vm537_vm4, %v1777_v59  ;;  %1449 = vmatprep.mubr.msk.bf16.mxu0 %vm537_vm4, %v1546_v60 }
 0x18f   : > { %1473 = vmatprep.mubr.msk.bf16.mxu1 %vm537_vm4, %v1781_v61 }
 0x195   : > { %1450 = vmatmul.mubr.msk.bf16.gmra.mrb[8].mxu0 %vm537_vm4, %v1548_v62 }
 0x196   : > { %1474 = vmatmul.mubr.msk.bf16.gmra.mrb[8].mxu1 %vm537_vm4, %v1791_v63  ;;  %1453 = vmatprep.mubr.msk.bf16.mxu0 %vm537_vm4, %v1550_v0 }
 0x197   : > { %1477 = vmatprep.mubr.msk.bf16.mxu1 %vm537_vm4, %v1795_v1 }
 0x19d   : > { %1454 = vmatmul.mubr.msk.bf16.gmra.mrb[12].mxu0 %vm537_vm4, %v1552_v2 }
 0x19e   : > { %1478 = vmatmul.mubr.msk.bf16.gmra.mrb[12].mxu1 %vm537_vm4, %v1805_v3 }
 0x258   : > { %v1810_v4 = vpop.f32.mrb[0].mxu0 }
 0x259   : > { %v1467_v5 = vpop.f32.mrb[0].mxu1  ;;  %v1813_v7 = vpop.f32.mrb[1].mxu0 }
 0x25a   : > { %v766_v6 = vadd.f32 %v1467_v5, %v1810_v4  ;;  %v757_v8 = vpop.f32.mrb[1].mxu1  ;;  %v1816_v10 = vpop.f32.mrb[2].mxu0 }
 0x25b   : > { %v758_v9 = vadd.f32 %v757_v8, %v1813_v7  ;;  %v1468_v11 = vpop.f32.mrb[2].mxu1  ;;  %v1819_v14 = vpop.f32.mrb[3].mxu0 }
 0x25c   : > { %v838_v12 = vmul.f32 0.2, %v766_v6  ;;  %v769_v13 = vadd.f32 %v1468_v11, %v1816_v10  ;;  %v760_v15 = vpop.f32.mrb[3].mxu1  ;;  %vm822_vm5 = vcmp.gt.f32.partialorder %v766_v6, 0.0 }
 0x25d   : > { %v836_v16 = vmul.f32 0.2, %v758_v9  ;;  %v761_v17 = vadd.f32 %v760_v15, %v1819_v14  ;;  %vm820_vm7 = vcmp.gt.f32.partialorder %v758_v9, 0.0 }
 0x25e   : > { %v839_v18 = vmul.f32 0.2, %v769_v13  ;;  %v1822_v19 = vsel %vm822_vm5, %v766_v6, %v838_v12  ;;  %vm823_vm8 = vcmp.gt.f32.partialorder %v769_v13, 0.0 }
 0x25f   : > { %v837_v20 = vmul.f32 0.2, %v761_v17  ;;  %v875_v21 = vsel %vm868_vm6, %v1822_v19, -inf  ;;  %v1826_v22 = vsel %vm820_vm7, %v758_v9, %v836_v16  ;;  %vm821_vm9 = vcmp.gt.f32.partialorder %v761_v17, 0.0 }
 0x260   : > { %876 = vmax.xlane.f32.xlu1 %v875_v21  ;;  %v869_v23 = vsel %vm868_vm6, %v1826_v22, -inf  ;;  %v1830_v24 = vsel %vm823_vm8, %v769_v13, %v839_v18  ;;  %v1832_v25 = vpop.f32.mrb[4].mxu0 }
 0x261   : > { %v1471_v26 = vpop.f32.mrb[4].mxu1  ;;  %870 = vmax.xlane.f32.xlu0 %v869_v23  ;;  %v1834_v27 = vsel %vm821_vm9, %v761_v17, %v837_v20  ;;  %v1837_v29 = vpop.f32.mrb[5].mxu0  ;;  %v878_v34 = vsel %vm868_vm6, %v1830_v24, -inf }
 0x262   : > { %v782_v28 = vadd.f32 %v1471_v26, %v1832_v25  ;;  %v773_v30 = vpop.f32.mrb[5].mxu1  ;;  %v1840_v32 = vpop.f32.mrb[6].mxu0  ;;  %v872_v38 = vsel %vm868_vm6, %v1834_v27, -inf }
 0x263   : > { %v774_v31 = vadd.f32 %v773_v30, %v1837_v29  ;;  %v1472_v33 = vpop.f32.mrb[6].mxu1  ;;  %v1845_v36 = vpop.f32.mrb[7].mxu0 }
 0x264   : > { %v785_v35 = vadd.f32 %v1472_v33, %v1840_v32  ;;  %879 = vmax.xlane.f32.xlu1 %v878_v34  ;;  %v776_v37 = vpop.f32.mrb[7].mxu1  ;;  %v842_v39 = vmul.f32 0.2, %v782_v28  ;;  %vm826_vm11 = vcmp.gt.f32.partialorder %v782_v28, 0.0 }
 0x265   : > { %v840_v40 = vmul.f32 0.2, %v774_v31  ;;  %v777_v41 = vadd.f32 %v776_v37, %v1845_v36  ;;  %873 = vmax.xlane.f32.xlu0 %v872_v38  ;;  %vm824_vm10 = vcmp.gt.f32.partialorder %v774_v31, 0.0 }
 0x266   : > { %v843_v42 = vmul.f32 0.2, %v785_v35  ;;  %vm827_vm13 = vcmp.gt.f32.partialorder %v785_v35, 0.0  ;;  %v1858_v49 = vsel %vm826_vm11, %v782_v28, %v842_v39 }
 0x267   : > { %v841_v43 = vmul.f32 0.2, %v777_v41  ;;  %v1850_v44 = vsel %vm824_vm10, %v774_v31, %v840_v40  ;;  %vm825_vm12 = vcmp.gt.f32.partialorder %v777_v41, 0.0  ;;  %v887_v6 = vsel %vm868_vm6, %v1858_v49, -inf }
 0x268   : > { %v881_v45 = vsel %vm868_vm6, %v1850_v44, -inf  ;;  %v1854_v46 = vpop.f32.mrb[8].mxu0  ;;  %v1868_v62 = vsel %vm827_vm13, %v785_v35, %v843_v42 }
 0x269   : > { %v1475_v47 = vpop.f32.mrb[8].mxu1  ;;  %882 = vmax.xlane.f32.xlu0 %v881_v45  ;;  %v1856_v48 = vsel %vm825_vm12, %v777_v41, %v841_v43  ;;  %v1861_v52 = vpop.f32.mrb[9].mxu0  ;;  %v890_v12 = vsel %vm868_vm6, %v1868_v62, -inf }
 0x26a   : > { %v798_v50 = vadd.f32 %v1475_v47, %v1854_v46  ;;  %v789_v53 = vpop.f32.mrb[9].mxu1  ;;  %v884_v54 = vsel %vm868_vm6, %v1856_v48, -inf  ;;  %v1866_v58 = vpop.f32.mrb[10].mxu0 }
 0x26b   : > { %v790_v56 = vadd.f32 %v789_v53, %v1861_v52  ;;  %v1476_v60 = vpop.f32.mrb[10].mxu1  ;;  %885 = vmax.xlane.f32.xlu1 %v884_v54  ;;  %v1871_v2 = vpop.f32.mrb[11].mxu0 }
 0x26c   : > { %v801_v0 = vadd.f32 %v1476_v60, %v1866_v58  ;;  %v792_v5 = vpop.f32.mrb[11].mxu1  ;;  %v846_v8 = vmul.f32 0.2, %v798_v50  ;;  %vm830_vm15 = vcmp.gt.f32.partialorder %v798_v50, 0.0 }
 0x26d   : > { %v844_v9 = vmul.f32 0.2, %v790_v56  ;;  %v793_v11 = vadd.f32 %v792_v5, %v1871_v2  ;;  %888 = vmax.xlane.f32.xlu0 %v887_v6  ;;  %vm828_vm14 = vcmp.gt.f32.partialorder %v790_v56, 0.0 }
 0x26e   : > { %v847_v13 = vmul.f32 0.2, %v801_v0  ;;  %vm831_vm1 = vcmp.gt.f32.partialorder %v801_v0, 0.0  ;;  %v1886_v23 = vsel %vm830_vm15, %v798_v50, %v846_v8 }
 0x26f   : > { %v845_v15 = vmul.f32 0.2, %v793_v11  ;;  %891 = vmax.xlane.f32.xlu1 %v890_v12  ;;  %v1878_v16 = vsel %vm828_vm14, %v790_v56, %v844_v9  ;;  %vm829_vm0 = vcmp.gt.f32.partialorder %v793_v11, 0.0  ;;  %v899_v41 = vsel %vm868_vm6, %v1886_v23, -inf }
 0x270   : > { %v893_v17 = vsel %vm868_vm6, %v1878_v16, -inf  ;;  %v1882_v18 = vpop.f32.mrb[12].mxu0  ;;  %v1896_v37 = vsel %vm831_vm1, %v801_v0, %v847_v13 }
 0x271   : > { %v1479_v20 = vpop.f32.mrb[12].mxu1  ;;  %894 = vmax.xlane.f32.xlu0 %v893_v17  ;;  %v1884_v21 = vsel %vm829_vm0, %v793_v11, %v845_v15  ;;  %v1889_v28 = vpop.f32.mrb[13].mxu0  ;;  %v902_v47 = vsel %vm868_vm6, %v1896_v37, -inf }
 0x272   : > { %v814_v26 = vadd.f32 %v1479_v20, %v1882_v18  ;;  %v805_v30 = vpop.f32.mrb[13].mxu1  ;;  %v896_v31 = vsel %vm868_vm6, %v1884_v21, -inf  ;;  %v1894_v34 = vpop.f32.mrb[14].mxu0 }
 0x273   : > { %v806_v33 = vadd.f32 %v805_v30, %v1889_v28  ;;  %v1480_v35 = vpop.f32.mrb[14].mxu1  ;;  %897 = vmax.xlane.f32.xlu1 %v896_v31  ;;  %v1899_v39 = vpop.f32.mrb[15].mxu0 }
 0x274   : > { %v817_v38 = vadd.f32 %v1480_v35, %v1894_v34  ;;  %v808_v40 = vpop.f32.mrb[15].mxu1  ;;  %v850_v42 = vmul.f32 0.2, %v814_v26  ;;  %vm834_vm3 = vcmp.gt.f32.partialorder %v814_v26, 0.0 }
 0x275   : > { %v848_v43 = vmul.f32 0.2, %v806_v33  ;;  %v809_v45 = vadd.f32 %v808_v40, %v1899_v39  ;;  %900 = vmax.xlane.f32.xlu0 %v899_v41  ;;  %vm832_vm2 = vcmp.gt.f32.partialorder %v806_v33, 0.0 }
 0x276   : > { %v851_v50 = vmul.f32 0.2, %v817_v38  ;;  %vm835_vm5 = vcmp.gt.f32.partialorder %v817_v38, 0.0  ;;  %v1912_v0 = vsel %vm834_vm3, %v814_v26, %v850_v42 }
 0x277   : > { %v849_v53 = vmul.f32 0.2, %v809_v45  ;;  %903 = vmax.xlane.f32.xlu1 %v902_v47  ;;  %v1906_v54 = vsel %vm832_vm2, %v806_v33, %v848_v43  ;;  %vm833_vm4 = vcmp.gt.f32.partialorder %v809_v45, 0.0  ;;  %v911_v8 = vsel %vm868_vm6, %v1912_v0, -inf }
 0x278   : > { %v905_v56 = vsel %vm868_vm6, %v1906_v54, -inf  ;;  %v1916_v6 = vsel %vm835_vm5, %v817_v38, %v851_v50 }
 0x279   : > { %906 = vmax.xlane.f32.xlu0 %v905_v56  ;;  %v1910_v60 = vsel %vm833_vm4, %v809_v45, %v849_v53  ;;  %v914_v9 = vsel %vm868_vm6, %v1916_v6, -inf }
 0x27a   : > { %v908_v5 = vsel %vm868_vm6, %v1910_v60, -inf }
 0x27b   : > { %909 = vmax.xlane.f32.xlu1 %v908_v5 }
 0x27d   : > { %912 = vmax.xlane.f32.xlu0 %v911_v8 }
 0x27f   : > { %915 = vmax.xlane.f32.xlu1 %v914_v9 }
 0x2ed   : > { %v877_v11 = vpop.xlane.xlu1 %876 }
 0x2ee   : > { %v919_v12 = vsub.f32 %v1822_v19, %v877_v11  ;;  %v871_v13 = vpop.xlane.xlu0 %870 }
 0x2ef   : > { %v917_v15 = vsub.f32 %v1826_v22, %v871_v13 }
 0x2f0   : > { %v937_v17 = vmul.f32 1.442695, %v919_v12 }
 0x2f1   : > { %v933_v20 = vmul.f32 1.442695, %v917_v15  ;;  %v880_v26 = vpop.xlane.xlu1 %879 }
 0x2f2   : > { %v920_v30 = vsub.f32 %v1830_v24, %v880_v26  ;;  %v874_v31 = vpop.xlane.xlu0 %873 }
 0x2f3   : > { %1554 = vpow2.f32 %v933_v20  ;;  %v918_v33 = vsub.f32 %v1834_v27, %v874_v31 }
 0x2f4   : > { %1556 = vpow2.f32 %v937_v17  ;;  %v939_v35 = vmul.f32 1.442695, %v920_v30 }
 0x2f5   : > { %v935_v38 = vmul.f32 1.442695, %v918_v33 }
 0x2f6   : > { %v883_v40 = vpop.xlane.xlu0 %882 }
 0x2f7   : > { %1558 = vpow2.f32 %v935_v38  ;;  %v921_v41 = vsub.f32 %v1850_v44, %v883_v40 }
 0x2f8   : > { %v886_v19 = vpop.xlane.xlu1 %885  ;;  %1560 = vpow2.f32 %v939_v35 }
 0x2f9   : > { %v941_v42 = vmul.f32 1.442695, %v921_v41  ;;  %v922_v22 = vsub.f32 %v1856_v48, %v886_v19 }
 0x2fa   : > { %v889_v43 = vpop.xlane.xlu0 %888 }
 0x2fb   : > { %1562 = vpow2.f32 %v941_v42  ;;  %v943_v45 = vmul.f32 1.442695, %v922_v22  ;;  %v923_v24 = vsub.f32 %v1858_v49, %v889_v43 }
 0x2fc   : > { %v892_v47 = vpop.xlane.xlu1 %891 }
 0x2fd   : > { %v1929_v50 = vpop.eup %1554  ;;  %1564 = vpow2.f32 %v943_v45  ;;  %v945_v27 = vmul.f32 1.442695, %v923_v24  ;;  %v924_v53 = vsub.f32 %v1868_v62, %v892_v47 }
 0x2fe   : > { %v895_v56 = vpop.xlane.xlu0 %894  ;;  %v965_v44 = vsel %vm868_vm6, %v1929_v50, 0.0  ;;  %v1934_v5 = vpop.eup %1556 }
 0x2ff   : > { %1566 = vpow2.f32 %v945_v27  ;;  %v947_v48 = vmul.f32 1.442695, %v924_v53  ;;  %v925_v8 = vsub.f32 %v1878_v16, %v895_v56  ;;  %966 = vadd.xlane.f32.xlu0 %v965_v44  ;;  %v971_v62 = vsel %vm868_vm6, %v1934_v5, 0.0 }
 0x300   : > { %v898_v9 = vpop.xlane.xlu1 %897 }
 0x301   : > { %v1937_v49 = vpop.eup %1558  ;;  %1568 = vpow2.f32 %v947_v48  ;;  %v949_v11 = vmul.f32 1.442695, %v925_v8  ;;  %v926_v12 = vsub.f32 %v1884_v21, %v898_v9 }
 0x302   : > { %v901_v13 = vpop.xlane.xlu0 %900  ;;  %v968_v15 = vsel %vm868_vm6, %v1937_v49, 0.0  ;;  %v1944_v17 = vpop.eup %1560 }
 0x303   : > { %1570 = vpow2.f32 %v949_v11  ;;  %v951_v20 = vmul.f32 1.442695, %v926_v12  ;;  %v927_v16 = vsub.f32 %v1886_v23, %v901_v13  ;;  %972 = vadd.xlane.f32.xlu0 %v971_v62  ;;  %969 = vadd.xlane.f32.xlu1 %v968_v15  ;;  %v974_v35 = vsel %vm868_vm6, %v1944_v17, 0.0 }
 0x304   : > { %v904_v26 = vpop.xlane.xlu1 %903 }
 0x305   : > { %v1947_v30 = vpop.eup %1562  ;;  %1572 = vpow2.f32 %v951_v20  ;;  %v953_v21 = vmul.f32 1.442695, %v927_v16  ;;  %v928_v31 = vsub.f32 %v1896_v37, %v904_v26 }
 0x306   : > { %v907_v33 = vpop.xlane.xlu0 %906  ;;  %v977_v38 = vsel %vm868_vm6, %v1947_v30, 0.0 }
 0x307   : > { %v1954_v40 = vpop.eup %1564  ;;  %1574 = vpow2.f32 %v953_v21  ;;  %v955_v23 = vmul.f32 1.442695, %v928_v31  ;;  %v929_v41 = vsub.f32 %v1906_v54, %v907_v33  ;;  %975 = vadd.xlane.f32.xlu1 %v974_v35  ;;  %978 = vadd.xlane.f32.xlu0 %v977_v38 }
 0x308   : > { %v910_v19 = vpop.xlane.xlu1 %909  ;;  %v980_v45 = vsel %vm868_vm6, %v1954_v40, 0.0 }
 0x309   : > { %v1957_v42 = vpop.eup %1566  ;;  %1576 = vpow2.f32 %v955_v23  ;;  %v957_v37 = vmul.f32 1.442695, %v929_v41  ;;  %v930_v22 = vsub.f32 %v1910_v60, %v910_v19 }
 0x30a   : > { %v913_v43 = vpop.xlane.xlu0 %912  ;;  %v983_v24 = vsel %vm868_vm6, %v1957_v42, 0.0 }
 0x30b   : > { %v1964_v47 = vpop.eup %1568  ;;  %1578 = vpow2.f32 %v957_v37  ;;  %v959_v54 = vmul.f32 1.442695, %v930_v22  ;;  %v931_v27 = vsub.f32 %v1912_v0, %v913_v43  ;;  %981 = vadd.xlane.f32.xlu1 %v980_v45  ;;  %984 = vadd.xlane.f32.xlu0 %v983_v24 }
 0x30c   : > { %v916_v53 = vpop.xlane.xlu1 %915  ;;  %v986_v48 = vsel %vm868_vm6, %v1964_v47, 0.0 }
 0x30d   : > { %v1967_v56 = vpop.eup %1570  ;;  %1580 = vpow2.f32 %v959_v54  ;;  %v961_v60 = vmul.f32 1.442695, %v931_v27  ;;  %v932_v44 = vsub.f32 %v1916_v6, %v916_v53 }
 0x30e   : > { %v989_v8 = vsel %vm868_vm6, %v1967_v56, 0.0 }
 0x30f   : > { %v1974_v9 = vpop.eup %1572  ;;  %1582 = vpow2.f32 %v961_v60  ;;  %v963_v11 = vmul.f32 1.442695, %v932_v44  ;;  %987 = vadd.xlane.f32.xlu1 %v986_v48  ;;  %990 = vadd.xlane.f32.xlu0 %v989_v8 }
 0x310   : > { %v992_v12 = vsel %vm868_vm6, %v1974_v9, 0.0 }
 0x311   : > { %v1976_v0 = vpop.eup %1574  ;;  %1584 = vpow2.f32 %v963_v11 }
 0x312   : > { %v995_v6 = vsel %vm868_vm6, %v1976_v0, 0.0 }
 0x313   : > { %v1982_v13 = vpop.eup %1576  ;;  %993 = vadd.xlane.f32.xlu1 %v992_v12  ;;  %996 = vadd.xlane.f32.xlu0 %v995_v6 }
 0x314   : > { %v998_v15 = vsel %vm868_vm6, %v1982_v13, 0.0 }
 0x315   : > { %v1984_v62 = vpop.eup %1578 }
 0x316   : > { %v1001_v20 = vsel %vm868_vm6, %v1984_v62, 0.0 }
 0x317   : > { %v1990_v16 = vpop.eup %1580  ;;  %999 = vadd.xlane.f32.xlu1 %v998_v15  ;;  %1002 = vadd.xlane.f32.xlu0 %v1001_v20 }
 0x318   : > { %v1004_v21 = vsel %vm868_vm6, %v1990_v16, 0.0 }
 0x319   : > { %v1992_v26 = vpop.eup %1582 }
 0x31a   : > { %v1007_v31 = vsel %vm868_vm6, %v1992_v26, 0.0 }
 0x31b   : > { %v1998_v33 = vpop.eup %1584  ;;  %1005 = vadd.xlane.f32.xlu1 %v1004_v21  ;;  %1008 = vadd.xlane.f32.xlu0 %v1007_v31 }
 0x31c   : > { %v1010_v35 = vsel %vm868_vm6, %v1998_v33, 0.0 }
 0x31f   : > { %1011 = vadd.xlane.f32.xlu1 %v1010_v35 }
 0x38c   : > { %v967_v38 = vpop.xlane.xlu0 %966 }
 0x38d   : > { %1586 = vrcp.f32 %v967_v38 }
 0x390   : > { %v970_v23 = vpop.xlane.xlu1 %969  ;;  %v973_v41 = vpop.xlane.xlu0 %972 }
 0x391   : > { %1588 = vrcp.f32 %v970_v23 }
 0x392   : > { %1590 = vrcp.f32 %v973_v41 }
 0x394   : > { %v976_v19 = vpop.xlane.xlu1 %975  ;;  %v979_v37 = vpop.xlane.xlu0 %978 }
 0x395   : > { %1592 = vrcp.f32 %v976_v19 }
 0x396   : > { %1594 = vrcp.f32 %v979_v37 }
 0x397   : > { %v1587_v22 = vpop.eup %1586 }
 0x398   : > { %v982_v43 = vpop.xlane.xlu1 %981  ;;  %v985_v45 = vpop.xlane.xlu0 %984  ;;  %v1029_v24 = vmul.f32 %v1587_v22, %v1929_v50 }
 0x399   : > { %1596 = vrcp.f32 %v982_v43 }
 0x39a   : > { %1598 = vrcp.f32 %v985_v45  ;;  %v1045_v54 = vsel %vm868_vm6, %v1029_v24, 0.0 }
 0x39b   : > { %v1589_v27 = vpop.eup %1588  ;;  %1046 = vadd.xlane.f32.xlu0 %v1045_v54 }
 0x39c   : > { %v1591_v53 = vpop.eup %1590  ;;  %v988_v60 = vpop.xlane.xlu1 %987  ;;  %v1030_v48 = vmul.f32 %v1589_v27, %v1937_v49 }
 0x39d   : > { %v991_v44 = vpop.xlane.xlu0 %990  ;;  %1600 = vrcp.f32 %v988_v60  ;;  %v1031_v8 = vmul.f32 %v1591_v53, %v1934_v5 }
 0x39e   : > { %1602 = vrcp.f32 %v991_v44  ;;  %v1048_v11 = vsel %vm868_vm6, %v1030_v48, 0.0 }
 0x39f   : > { %v1593_v12 = vpop.eup %1592  ;;  %1049 = vadd.xlane.f32.xlu1 %v1048_v11  ;;  %v1051_v50 = vsel %vm868_vm6, %v1031_v8, 0.0 }
 0x3a0   : > { %v1595_v6 = vpop.eup %1594  ;;  %1052 = vadd.xlane.f32.xlu0 %v1051_v50  ;;  %v994_v15 = vpop.xlane.xlu1 %993  ;;  %v1032_v21 = vmul.f32 %v1593_v12, %v1944_v17 }
 0x3a1   : > { %v997_v20 = vpop.xlane.xlu0 %996  ;;  %1604 = vrcp.f32 %v994_v15  ;;  %v1033_v31 = vmul.f32 %v1595_v6, %v1947_v30 }
 0x3a2   : > { %1606 = vrcp.f32 %v997_v20  ;;  %v1054_v49 = vsel %vm868_vm6, %v1032_v21, 0.0 }
 0x3a3   : > { %v1597_v5 = vpop.eup %1596  ;;  %1055 = vadd.xlane.f32.xlu1 %v1054_v49  ;;  %v1057_v35 = vsel %vm868_vm6, %v1033_v31, 0.0 }
 0x3a4   : > { %v1599_v38 = vpop.eup %1598  ;;  %1058 = vadd.xlane.f32.xlu0 %v1057_v35  ;;  %v1000_v23 = vpop.xlane.xlu1 %999  ;;  %v1034_v19 = vmul.f32 %v1597_v5, %v1954_v40 }
 0x3a5   : > { %v1003_v41 = vpop.xlane.xlu0 %1002  ;;  %1608 = vrcp.f32 %v1000_v23  ;;  %v1035_v37 = vmul.f32 %v1599_v38, %v1957_v42 }
 0x3a6   : > { %1610 = vrcp.f32 %v1003_v41  ;;  %v1060_v17 = vsel %vm868_vm6, %v1034_v19, 0.0 }
 0x3a7   : > { %v1601_v30 = vpop.eup %1600  ;;  %1061 = vadd.xlane.f32.xlu1 %v1060_v17  ;;  %v1063_v22 = vsel %vm868_vm6, %v1035_v37, 0.0 }
 0x3a8   : > { %v1603_v43 = vpop.eup %1602  ;;  %1064 = vadd.xlane.f32.xlu0 %v1063_v22  ;;  %v1006_v45 = vpop.xlane.xlu1 %1005  ;;  %v1036_v54 = vmul.f32 %v1601_v30, %v1964_v47 }
 0x3a9   : > { %v1009_v24 = vpop.xlane.xlu0 %1008  ;;  %1612 = vrcp.f32 %v1006_v45  ;;  %v1037_v27 = vmul.f32 %v1603_v43, %v1967_v56 }
 0x3aa   : > { %1614 = vrcp.f32 %v1009_v24  ;;  %v1066_v40 = vsel %vm868_vm6, %v1036_v54, 0.0 }
 0x3ab   : > { %v1605_v42 = vpop.eup %1604  ;;  %1067 = vadd.xlane.f32.xlu1 %v1066_v40  ;;  %v1069_v53 = vsel %vm868_vm6, %v1037_v27, 0.0 }
 0x3ac   : > { %v1607_v60 = vpop.eup %1606  ;;  %1070 = vadd.xlane.f32.xlu0 %v1069_v53  ;;  %v1012_v44 = vpop.xlane.xlu1 %1011  ;;  %v1038_v48 = vmul.f32 %v1605_v42, %v1974_v9 }
 0x3ad   : > { %1616 = vrcp.f32 %v1012_v44  ;;  %v1039_v8 = vmul.f32 %v1607_v60, %v1976_v0 }
 0x3ae   : > { %v1072_v47 = vsel %vm868_vm6, %v1038_v48, 0.0 }
 0x3af   : > { %v1609_v11 = vpop.eup %1608  ;;  %1073 = vadd.xlane.f32.xlu1 %v1072_v47  ;;  %v1075_v56 = vsel %vm868_vm6, %v1039_v8, 0.0 }
 0x3b0   : > { %v1611_v12 = vpop.eup %1610  ;;  %1076 = vadd.xlane.f32.xlu0 %v1075_v56  ;;  %v1040_v50 = vmul.f32 %v1609_v11, %v1982_v13 }
 0x3b1   : > { %v1041_v6 = vmul.f32 %v1611_v12, %v1984_v62 }
 0x3b2   : > { %v1078_v15 = vsel %vm868_vm6, %v1040_v50, 0.0 }
 0x3b3   : > { %v1613_v20 = vpop.eup %1612  ;;  %1079 = vadd.xlane.f32.xlu1 %v1078_v15  ;;  %v1081_v9 = vsel %vm868_vm6, %v1041_v6, 0.0 }
 0x3b4   : > { %v1615_v21 = vpop.eup %1614  ;;  %1082 = vadd.xlane.f32.xlu0 %v1081_v9  ;;  %v1042_v0 = vmul.f32 %v1613_v20, %v1990_v16 }
 0x3b5   : > { %v1043_v31 = vmul.f32 %v1615_v21, %v1992_v26 }
 0x3b6   : > { %v1084_v49 = vsel %vm868_vm6, %v1042_v0, 0.0 }
 0x3b7   : > { %v1617_v5 = vpop.eup %1616  ;;  %1085 = vadd.xlane.f32.xlu1 %v1084_v49  ;;  %v1087_v13 = vsel %vm868_vm6, %v1043_v31, 0.0 }
 0x3b8   : > { %1088 = vadd.xlane.f32.xlu0 %v1087_v13  ;;  %v1044_v62 = vmul.f32 %v1617_v5, %v1998_v33 }
 0x3ba   : > { %v1090_v35 = vsel %vm868_vm6, %v1044_v62, 0.0  ;;  %vm1270_vm6 = vcmask 261120  }
 0x3bb   : > { %1091 = vadd.xlane.f32.xlu1 %v1090_v35 }
 0x428   : > { %v1047_v38 = vpop.xlane.xlu0 %1046 }
 0x429   : > { %v1093_v23 = vmul.f32 0.33333334, %v1047_v38 }
 0x42b   : > { %v1109_v16 = vmul.f32 %v1093_v23, %v1813_v7 }
 0x42c   : > { %v1050_v41 = vpop.xlane.xlu1 %1049 }
 0x42d   : > { %v1094_v19 = vmul.f32 0.33333334, %v1050_v41  ;;  %v1053_v37 = vpop.xlane.xlu0 %1052 }
 0x42e   : > { %v1095_v17 = vmul.f32 0.33333334, %v1053_v37  ;;  %v1135_v37 = vld [vmem:[%s2130_s5 + $0x10] sm:$0xff] }
 0x42f   : > { %v1110_v26 = vmul.f32 %v1094_v19, %v1819_v14 }
 0x430   : > { %v1056_v30 = vpop.xlane.xlu1 %1055  ;;  %v1111_v24 = vmul.f32 %v1810_v4, %v1095_v17  ;;  %v1136_v17 = vld [vmem:[%s2130_s5 + $0x18] sm:$0xff] }
 0x431   : > { %v1096_v22 = vmul.f32 0.33333334, %v1056_v30  ;;  %v1059_v43 = vpop.xlane.xlu0 %1058  ;;  %v1125_v45 = vpack.c.bf16 %v1110_v26, %v1109_v16  ;;  %v1133_v16 = vld [vmem:[%s2130_s5] sm:$0xff] }
 0x432   : > { %v1097_v54 = vmul.f32 0.33333334, %v1059_v43  ;;  %v1134_v43 = vld [vmem:[%s2130_s5 + $0x8] sm:$0xff] }
 0x433   : > { %v1112_v33 = vmul.f32 %v1816_v10, %v1096_v22  ;;  %1173 = vrot.lane.b32.xlu0 %v1125_v45, %s1628_s24 }
 0x434   : > { %v1062_v27 = vpop.xlane.xlu1 %1061  ;;  %v1113_v7 = vmul.f32 %v1097_v54, %v1837_v29 }
 0x435   : > { %v1098_v40 = vmul.f32 0.33333334, %v1062_v27  ;;  %v1065_v42 = vpop.xlane.xlu0 %1064  ;;  %v1126_v53 = vpack.c.bf16 %v1112_v33, %v1111_v24 }
 0x436   : > { %v1099_v60 = vmul.f32 0.33333334, %v1065_v42  ;;  %v1137_v42 = vld [vmem:[%s2130_s5 + $0x20] sm:$0xff] }
 0x437   : > { %v1114_v14 = vmul.f32 %v1098_v40, %v1845_v36  ;;  %1175 = vrot.lane.b32.xlu1 %v1126_v53, %s1628_s24  ;;  %v1139_v40 = vld [vmem:[%s2130_s5 + $0x30] sm:$0xff] }
 0x438   : > { %v1068_v44 = vpop.xlane.xlu1 %1067  ;;  %v1115_v10 = vmul.f32 %v1832_v25, %v1099_v60 }
 0x439   : > { %v1100_v48 = vmul.f32 0.33333334, %v1068_v44  ;;  %v1071_v4 = vpop.xlane.xlu0 %1070  ;;  %v1127_v8 = vpack.c.bf16 %v1114_v14, %v1113_v7  ;;  %v1140_v7 = vld [vmem:[%s2130_s5 + $0x38] sm:$0xff]  ;;  %v1138_v44 = vld [vmem:[%s2130_s5 + $0x28] sm:$0xff] }
 0x43a   : > { %v1101_v11 = vmul.f32 0.33333334, %v1071_v4 }
 0x43b   : > { %v1116_v47 = vmul.f32 %v1840_v32, %v1100_v48  ;;  %1177 = vrot.lane.b32.xlu1 %v1127_v8, %s1628_s24 }
 0x43c   : > { %v1074_v56 = vpop.xlane.xlu1 %1073  ;;  %v1117_v36 = vmul.f32 %v1101_v11, %v1861_v52 }
 0x43d   : > { %v1102_v12 = vmul.f32 0.33333334, %v1074_v56  ;;  %v1077_v50 = vpop.xlane.xlu0 %1076  ;;  %v1128_v29 = vpack.c.bf16 %v1116_v47, %v1115_v10 }
 0x43e   : > { %v1103_v15 = vmul.f32 0.33333334, %v1077_v50 }
 0x43f   : > { %v1118_v6 = vmul.f32 %v1102_v12, %v1871_v2  ;;  %1179 = vrot.lane.b32.xlu1 %v1128_v29, %s1628_s24 }
 0x440   : > { %v1080_v20 = vpop.xlane.xlu1 %1079  ;;  %v1119_v32 = vmul.f32 %v1854_v46, %v1103_v15 }
 0x441   : > { %v1104_v9 = vmul.f32 0.33333334, %v1080_v20  ;;  %v1083_v21 = vpop.xlane.xlu0 %1082  ;;  %v1129_v25 = vpack.c.bf16 %v1118_v6, %v1117_v36 }
 0x442   : > { %v1105_v31 = vmul.f32 0.33333334, %v1083_v21 }
 0x443   : > { %v1120_v0 = vmul.f32 %v1866_v58, %v1104_v9  ;;  %1181 = vrot.lane.b32.xlu0 %v1129_v25, %s1628_s24 }
 0x444   : > { %v1086_v49 = vpop.xlane.xlu1 %1085  ;;  %v1121_v2 = vmul.f32 %v1105_v31, %v1889_v28 }
 0x445   : > { %v1106_v5 = vmul.f32 0.33333334, %v1086_v49  ;;  %v1089_v13 = vpop.xlane.xlu0 %1088  ;;  %v1130_v52 = vpack.c.bf16 %v1120_v0, %v1119_v32 }
 0x446   : > { %v1107_v35 = vmul.f32 0.33333334, %v1089_v13 }
 0x447   : > { %v1122_v62 = vmul.f32 %v1106_v5, %v1899_v39  ;;  %1183 = vrot.lane.b32.xlu1 %v1130_v52, %s1628_s24 }
 0x448   : > { %v1092_v38 = vpop.xlane.xlu1 %1091  ;;  %v1123_v46 = vmul.f32 %v1882_v18, %v1107_v35 }
 0x449   : > { %v1108_v23 = vmul.f32 0.33333334, %v1092_v38  ;;  %v1131_v41 = vpack.c.bf16 %v1122_v62, %v1121_v2 }
 0x44b   : > { %v1124_v58 = vmul.f32 %v1894_v34, %v1108_v23  ;;  %1185 = vrot.lane.b32.xlu0 %v1131_v41, %s1628_s24 }
 0x44d   : > { %v1132_v19 = vpack.c.bf16 %v1124_v58, %v1123_v46 }
 0x44f   : > { %1187 = vrot.lane.b32.xlu1 %v1132_v19, %s1628_s24 }
 0x469   : > { %1149 = vxpose.xlu0.c.b16.start [1/8] (narrow) %v1756_v51, 64 }
 0x46d   : > { %1150 = vxpose.xlu0.c.b16.cont [2/8] (narrow) %v1763_v55, 64 }
 0x471   : > { %1151 = vxpose.xlu0.c.b16.cont [3/8] (narrow) %v1767_v57, 64 }
 0x475   : > { %1152 = vxpose.xlu0.c.b16.cont [4/8] (narrow) %v1777_v59, 64 }
 0x479   : > { %1153 = vxpose.xlu0.c.b16.cont [5/8] (narrow) %v1781_v61, 64 }
 0x47d   : > { %1154 = vxpose.xlu0.c.b16.cont [6/8] (narrow) %v1791_v63, 64 }
 0x481   : > { %1155 = vxpose.xlu0.c.b16.cont [7/8] (narrow) %v1795_v1, 64 }
 0x485   : > { %1156 = vxpose.xlu0.c.b16.end [8/8] (narrow) %v1805_v3, 64 }
 0x4a5   : > { %v1174_v18 = vpop.permute.xlu0 %1173 }
 0x4a6   : > { %1481 = vmatprep.subr.bf16.mxu0 %v1174_v18  ;;  %1511 = vmatprep.subr.bf16.mxu1 %v1174_v18 }
 0x4a7   : > { %1482 = vmatpush3.bf16.msra.mxu0 %v1174_v18  ;;  %1519 = vmatpush3.bf16.msra.mxu1 %v1174_v18 }
 0x4a9   : > { %v1176_v51 = vpop.permute.xlu1 %1175 }
 0x4aa   : > { %1483 = vmatprep.subr.bf16.mxu0 %v1176_v51  ;;  %1512 = vmatprep.subr.bf16.mxu1 %v1176_v51 }
 0x4ab   : > { %1484 = vmatpush3.bf16.msra.mxu0 %v1176_v51  ;;  %1520 = vmatpush3.bf16.msra.mxu1 %v1176_v51 }
 0x4ad   : > { %v1178_v55 = vpop.permute.xlu1 %1177 }
 0x4ae   : > { %1485 = vmatprep.subr.bf16.mxu0 %v1178_v55  ;;  %1513 = vmatprep.subr.bf16.mxu1 %v1178_v55 }
 0x4af   : > { %1486 = vmatpush3.bf16.msra.mxu0 %v1178_v55  ;;  %1521 = vmatpush3.bf16.msra.mxu1 %v1178_v55 }
 0x4b1   : > { %v1180_v57 = vpop.permute.xlu1 %1179 }
 0x4b2   : > { %1487 = vmatprep.subr.bf16.mxu0 %v1180_v57  ;;  %1514 = vmatprep.subr.bf16.mxu1 %v1180_v57 }
 0x4b3   : > { %1488 = vmatpush3.bf16.msra.mxu0 %v1180_v57  ;;  %1522 = vmatpush3.bf16.msra.mxu1 %v1180_v57 }
 0x4b5   : > { %v1182_v59 = vpop.permute.xlu0 %1181 }
 0x4b6   : > { %1489 = vmatprep.subr.bf16.mxu0 %v1182_v59  ;;  %1515 = vmatprep.subr.bf16.mxu1 %v1182_v59 }
 0x4b7   : > { %1490 = vmatpush3.bf16.msra.mxu0 %v1182_v59  ;;  %1523 = vmatpush3.bf16.msra.mxu1 %v1182_v59 }
 0x4b9   : > { %v1184_v61 = vpop.permute.xlu1 %1183 }
 0x4ba   : > { %1491 = vmatprep.subr.bf16.mxu0 %v1184_v61  ;;  %1516 = vmatprep.subr.bf16.mxu1 %v1184_v61 }
 0x4bb   : > { %1492 = vmatpush3.bf16.msra.mxu0 %v1184_v61  ;;  %1524 = vmatpush3.bf16.msra.mxu1 %v1184_v61 }
 0x4bd   : > { %v1186_v63 = vpop.permute.xlu0 %1185 }
 0x4be   : > { %1493 = vmatprep.subr.bf16.mxu0 %v1186_v63  ;;  %1517 = vmatprep.subr.bf16.mxu1 %v1186_v63 }
 0x4bf   : > { %1494 = vmatpush3.bf16.msra.mxu0 %v1186_v63  ;;  %1525 = vmatpush3.bf16.msra.mxu1 %v1186_v63 }
 0x4c1   : > { %v1188_v1 = vpop.permute.xlu1 %1187 }
 0x4c2   : > { %1495 = vmatprep.subr.bf16.mxu0 %v1188_v1  ;;  %1518 = vmatprep.subr.bf16.mxu1 %v1188_v1 }
 0x4c3   : > { %1496 = vmatpush3.bf16.msra.mxu0 %v1188_v1  ;;  %1526 = vmatpush3.bf16.msra.mxu1 %v1188_v1 }
 0x4cf   : > { %v1157_v3 = vpop.trf.xlu0 }
 0x4d0   : > { %1497 = vmatprep.mubr.bf16.mxu0 %v1157_v3 }
 0x4d3   : > { %v1158_v28 = vpop.trf.xlu0 }
 0x4d4   : > { %1498 = vmatmul.mubr.bf16.vlgmr.msra.gmra.mrb[16].mxu0 %v1158_v28 }
 0x4d7   : > { %v1159_v34 = vpop.trf.xlu0 }
 0x4d8   : > { %1501 = vmatprep.mubr.bf16.mxu1 %v1159_v34 }
 0x4db   : > { %v1160_v39 = vpop.trf.xlu0 }
 0x4dc   : > { %1502 = vmatmul.mubr.bf16.vlgmr.msra.gmra.mrb[16].mxu1 %v1160_v39 }
 0x5a7   : > { %v1499_v26 = vpop.f32.mrb[16].mxu0 }
 0x5a8   : > { %v1264_v30 = vadd.f32 %v1499_v26, %v1135_v37  ;;  %v1231_v22 = vpop.f32.mrb[17].mxu0 }
 0x5a9   : > { %v1262_v45 = vadd.f32 %v1231_v22, %v1133_v16  ;;  %v1500_v24 = vpop.f32.mrb[18].mxu0 }
 0x5aa   : > { %1273 = vst.msk [vmem:[%s2130_s5 + $0x10] sm:$0xff] %vm1270_vm6, %v1264_v30  ;;  %v1265_v33 = vadd.f32 %v1500_v24, %v1136_v17  ;;  %v1234_v54 = vpop.f32.mrb[19].mxu0 }
 0x5ab   : > { %1271 = vst.msk [vmem:[%s2130_s5] sm:$0xff] %vm1270_vm6, %v1262_v45  ;;  %v1263_v27 = vadd.f32 %v1234_v54, %v1134_v43 }
 0x5ac   : > { %1274 = vst.msk [vmem:[%s2130_s5 + $0x18] sm:$0xff] %vm1270_vm6, %v1265_v33 }
 0x5ad   : > { %1272 = vst.msk [vmem:[%s2130_s5 + $0x8] sm:$0xff] %vm1270_vm6, %v1263_v27 }
 0x5af   : > { %v1503_v53 = vpop.f32.mrb[16].mxu1 }
 0x5b0   : > { %v1268_v14 = vadd.f32 %v1503_v53, %v1139_v40  ;;  %v1247_v60 = vpop.f32.mrb[17].mxu1 }
 0x5b1   : > { %v1266_v48 = vadd.f32 %v1247_v60, %v1137_v42  ;;  %v1504_v4 = vpop.f32.mrb[18].mxu1 }
 0x5b2   : > { %1277 = vst.msk [vmem:[%s2130_s5 + $0x30] sm:$0xff] %vm1270_vm6, %v1268_v14  ;;  %v1269_v8 = vadd.f32 %v1504_v4, %v1140_v7  ;;  %v1250_v10 = vpop.f32.mrb[19].mxu1 }
 0x5b3   : > { %1275 = vst.msk [vmem:[%s2130_s5 + $0x20] sm:$0xff] %vm1270_vm6, %v1266_v48  ;;  %v1267_v47 = vadd.f32 %v1250_v10, %v1138_v44 }
 0x5b4   : > { %1278 = vst.msk [vmem:[%s2130_s5 + $0x38] sm:$0xff] %vm1270_vm6, %v1269_v8 }
 0x5b5   : > { %1276 = vst.msk [vmem:[%s2130_s5 + $0x28] sm:$0xff] %vm1270_vm6, %v1267_v47 }
 0x5b6 PF: > { %s15_s18 = sadd.s32 1, %s1624_s18  }
 0x5b7   : > { %p12_p5 = scmp.ge.s32.totalorder %s15_s18, 4  }
 0x5b9   :  { %14 = sbr.rel (!%p12_p5) target bundleno = 1 (0x1), region = 73 }

</bundles_post_ra>
